<compile_context>
chip_gen: v5e
topology: v5e:2x2
jax: 0.10.0
libtpu: 0.0.40
codegen_flags: <defaults>
</compile_context>

<pallas_src>
import jax
import jax.numpy as jnp
from jax.experimental import pallas as pl
from jax.experimental.pallas import tpu as pltpu


def gresblock_kernel(x_ref, adj_ref, w1l1_ref, b1_ref, w2l2_ref, b2_ref,
                     out_ref):
    """Single-invocation kernel.

    x_ref:    (B*N, Fin)   float32   (batch folded into rows)
    adj_ref:  (B*N, B*N)   bfloat16  (block-diagonal adjacency)
    w1l1_ref: (Fin, 2H)    bfloat16  ([W1 | L1] fused)
    b1_ref:   (1, H)       float32
    w2l2_ref: (H, 2Fin)    bfloat16  ([W2 | L2] fused)
    b2_ref:   (1, Fin)     float32
    out_ref:  (B*N, Fin)   float32
    """
    hidden = w1l1_ref.shape[1] // 2
    fin = x_ref.shape[1]

    x_f32 = x_ref[...]                      # f32 copy kept for the residual add
    x = x_f32.astype(jnp.bfloat16)
    adj = adj_ref[...]                      # bf16

    # ---- GConv 1 (fused projection): z1 = x @ [W1 | L1] -> (BN, 2H) ----
    z1 = jnp.dot(x, w1l1_ref[...], preferred_element_type=jnp.float32)
    agg1 = jnp.dot(adj, z1[:, :hidden].astype(jnp.bfloat16),
                   preferred_element_type=jnp.float32)
    h = jnp.maximum(agg1 + z1[:, hidden:] + b1_ref[...], 0.0)      # (BN, H) f32

    # ---- GConv 2 (fused projection): z2 = h @ [W2 | L2] -> (BN, 2Fin) ----
    z2 = jnp.dot(h.astype(jnp.bfloat16), w2l2_ref[...],
                 preferred_element_type=jnp.float32)
    agg2 = jnp.dot(adj, z2[:, :fin].astype(jnp.bfloat16),
                   preferred_element_type=jnp.float32)
    y = jnp.maximum(agg2 + z2[:, fin:] + b2_ref[...], 0.0)         # (BN, Fin)

    # ---- residual + halve (f32) ----
    out_ref[...] = ((x_f32 + y) * 0.5).astype(out_ref.dtype)


def gresblock(x, adj, w1, l1, b1, w2, l2, b2):
    B, N, Fin = x.shape
    H = w1.shape[1]
    BN = B * N

    # Fold batch into rows; lift the (shared) adjacency to a block-diagonal
    # operator so the per-batch graph aggregation is one plain 2-D matmul.
    x2d = x.reshape(BN, Fin).astype(jnp.float32)
    adj_bd = jnp.kron(jnp.eye(B, dtype=adj.dtype), adj).astype(jnp.bfloat16)

    # Fuse the support / loop projections into one wide matmul per layer.
    w1l1 = jnp.concatenate([w1, l1], axis=1).astype(jnp.bfloat16)   # (Fin, 2H)
    w2l2 = jnp.concatenate([w2, l2], axis=1).astype(jnp.bfloat16)   # (H, 2Fin)

    vmem = pl.BlockSpec(memory_space=pltpu.MemorySpace.VMEM)
    out2d = pl.pallas_call(
        gresblock_kernel,
        out_shape=jax.ShapeDtypeStruct((BN, Fin), x.dtype),
        in_specs=[vmem] * 6,
        out_specs=vmem,
    )(x2d, adj_bd, w1l1,
      b1.reshape(1, H).astype(jnp.float32),
      w2l2,
      b2.reshape(1, Fin).astype(jnp.float32))

    return out2d.reshape(B, N, Fin)


def gresblock_ref(x, adj, w1, l1, b1, w2, l2, b2):
    """Pure-JAX float32 reference implementing the PyTorch forward exactly."""
    h = jnp.einsum('nm,bmh->bnh', adj, x @ w1) + x @ l1 + b1
    h = jax.nn.relu(h)
    y = jnp.einsum('nm,bmf->bnf', adj, h @ w2) + h @ l2 + b2
    y = jax.nn.relu(y)
    return (x + y) * 0.5


if __name__ == "__main__":
    B, N, IN_DIM, HIDDEN = 2, 16, 4, 32
    key = jax.random.PRNGKey(0)
    kx, kw1, kl1, kb1, kw2, kl2, kb2 = jax.random.split(key, 7)

    # Input features (B, N, Fin)
    x = jax.random.normal(kx, (B, N, IN_DIM), dtype=jnp.float32)

    # Deterministic symmetric-normalized adjacency of a ring graph + self loops.
    eye = jnp.eye(N, dtype=jnp.float32)
    ring = jnp.roll(eye, 1, axis=1) + jnp.roll(eye, -1, axis=1)
    a = ring + eye
    deg = jnp.sum(a, axis=1)
    d_inv_sqrt = 1.0 / jnp.sqrt(deg)
    adj = a * d_inv_sqrt[:, None] * d_inv_sqrt[None, :]

    # Xavier-uniform-like weight init (matches GConv __init__ shapes).
    def xavier(k, shape):
        fan_in, fan_out = shape
        lim = (6.0 / (fan_in + fan_out)) ** 0.5
        return jax.random.uniform(k, shape, jnp.float32, -lim, lim)

    w1 = xavier(kw1, (IN_DIM, HIDDEN))
    l1 = xavier(kl1, (IN_DIM, HIDDEN))
    b1 = jax.random.uniform(kb1, (1, HIDDEN), jnp.float32, -0.1, 0.1)
    w2 = xavier(kw2, (HIDDEN, IN_DIM))
    l2 = xavier(kl2, (HIDDEN, IN_DIM))
    b2 = jax.random.uniform(kb2, (1, IN_DIM), jnp.float32, -0.1, 0.1)

    out = gresblock(x, adj, w1, l1, b1, w2, l2, b2)
    out = jax.block_until_ready(out)

    expected = gresblock_ref(x, adj, w1, l1, b1, w2, l2, b2)
    assert out.shape == (B, N, IN_DIM)
    # bf16 MXU operands vs f32 reference -> loosened tolerance (per perf review).
    assert jnp.allclose(out, expected, atol=5e-2, rtol=5e-2), \
        "mismatch vs reference"

    print("KERNEL_OK")
</pallas_src>

<mosaic_0001>
module attributes {stable_mosaic.version = 11 : i64} {
  func.func @gresblock_kernel(%arg0: memref<32x4xf32, #tpu.memory_space<vmem>>, %arg1: memref<32x32xbf16, #tpu.memory_space<vmem>>, %arg2: memref<4x64xbf16, #tpu.memory_space<vmem>>, %arg3: memref<1x32xf32, #tpu.memory_space<vmem>>, %arg4: memref<32x8xbf16, #tpu.memory_space<vmem>>, %arg5: memref<1x4xf32, #tpu.memory_space<vmem>>, %arg6: memref<32x4xf32, #tpu.memory_space<vmem>>) attributes {dimension_semantics = [], scalar_prefetch = 0 : i64, scratch_operands = 0 : i64, tpu.core_type = #tpu.core_type<tc>} {
    %c0 = arith.constant 0 : index
    %c0_0 = arith.constant 0 : index
    %0 = vector.load %arg0[%c0, %c0_0] : memref<32x4xf32, #tpu.memory_space<vmem>>, vector<32x4xf32>
    %1 = arith.truncf %0 : vector<32x4xf32> to vector<32x4xbf16>
    %c0_1 = arith.constant 0 : index
    %c0_2 = arith.constant 0 : index
    %2 = vector.load %arg1[%c0_1, %c0_2] : memref<32x32xbf16, #tpu.memory_space<vmem>>, vector<32x32xbf16>
    %c0_3 = arith.constant 0 : index
    %c0_4 = arith.constant 0 : index
    %3 = vector.load %arg2[%c0_3, %c0_4] : memref<4x64xbf16, #tpu.memory_space<vmem>>, vector<4x64xbf16>
    %cst = arith.constant dense<0.000000e+00> : vector<32x64xf32>
    %4 = tpu.matmul %1, %3, %cst {dimension_numbers = #tpu.dot_dimension_numbers<[1], [0], [0], [1], [0, 0, 1, 1], [], []>} : vector<32x4xbf16>, vector<4x64xbf16>, vector<32x64xf32> -> vector<32x64xf32>
    %5 = vector.extract_strided_slice %4 {offsets = [0, 0], sizes = [32, 32], strides = [1, 1]} : vector<32x64xf32> to vector<32x32xf32>
    %6 = arith.truncf %5 : vector<32x32xf32> to vector<32x32xbf16>
    %cst_5 = arith.constant dense<0.000000e+00> : vector<32x32xf32>
    %7 = tpu.matmul %2, %6, %cst_5 {dimension_numbers = #tpu.dot_dimension_numbers<[1], [0], [0], [1], [0, 0, 1, 1], [], []>} : vector<32x32xbf16>, vector<32x32xbf16>, vector<32x32xf32> -> vector<32x32xf32>
    %8 = vector.extract_strided_slice %4 {offsets = [0, 32], sizes = [32, 32], strides = [1, 1]} : vector<32x64xf32> to vector<32x32xf32>
    %9 = arith.addf %7, %8 : vector<32x32xf32>
    %c0_6 = arith.constant 0 : index
    %c0_7 = arith.constant 0 : index
    %10 = vector.load %arg3[%c0_6, %c0_7] : memref<1x32xf32, #tpu.memory_space<vmem>>, vector<1x32xf32>
    %11 = vector.broadcast %10 : vector<1x32xf32> to vector<32x32xf32>
    %12 = arith.addf %9, %11 : vector<32x32xf32>
    %cst_8 = arith.constant 0.000000e+00 : f32
    %13 = vector.broadcast %cst_8 : f32 to vector<32x32xf32>
    %14 = arith.maximumf %12, %13 : vector<32x32xf32>
    %15 = arith.truncf %14 : vector<32x32xf32> to vector<32x32xbf16>
    %c0_9 = arith.constant 0 : index
    %c0_10 = arith.constant 0 : index
    %16 = vector.load %arg4[%c0_9, %c0_10] : memref<32x8xbf16, #tpu.memory_space<vmem>>, vector<32x8xbf16>
    %cst_11 = arith.constant dense<0.000000e+00> : vector<32x8xf32>
    %17 = tpu.matmul %15, %16, %cst_11 {dimension_numbers = #tpu.dot_dimension_numbers<[1], [0], [0], [1], [0, 0, 1, 1], [], []>} : vector<32x32xbf16>, vector<32x8xbf16>, vector<32x8xf32> -> vector<32x8xf32>
    %18 = vector.extract_strided_slice %17 {offsets = [0, 0], sizes = [32, 4], strides = [1, 1]} : vector<32x8xf32> to vector<32x4xf32>
    %19 = arith.truncf %18 : vector<32x4xf32> to vector<32x4xbf16>
    %cst_12 = arith.constant dense<0.000000e+00> : vector<32x4xf32>
    %20 = tpu.matmul %2, %19, %cst_12 {dimension_numbers = #tpu.dot_dimension_numbers<[1], [0], [0], [1], [0, 0, 1, 1], [], []>} : vector<32x32xbf16>, vector<32x4xbf16>, vector<32x4xf32> -> vector<32x4xf32>
    %21 = vector.extract_strided_slice %17 {offsets = [0, 4], sizes = [32, 4], strides = [1, 1]} : vector<32x8xf32> to vector<32x4xf32>
    %22 = arith.addf %20, %21 : vector<32x4xf32>
    %c0_13 = arith.constant 0 : index
    %c0_14 = arith.constant 0 : index
    %23 = vector.load %arg5[%c0_13, %c0_14] : memref<1x4xf32, #tpu.memory_space<vmem>>, vector<1x4xf32>
    %24 = vector.broadcast %23 : vector<1x4xf32> to vector<32x4xf32>
    %25 = arith.addf %22, %24 : vector<32x4xf32>
    %cst_15 = arith.constant 0.000000e+00 : f32
    %26 = vector.broadcast %cst_15 : f32 to vector<32x4xf32>
    %27 = arith.maximumf %25, %26 : vector<32x4xf32>
    %28 = arith.addf %0, %27 : vector<32x4xf32>
    %cst_16 = arith.constant 5.000000e-01 : f32
    %29 = vector.broadcast %cst_16 : f32 to vector<32x4xf32>
    %30 = arith.mulf %28, %29 : vector<32x4xf32>
    %c0_17 = arith.constant 0 : index
    %c0_18 = arith.constant 0 : index
    %31 = vector.load %arg6[%c0_17, %c0_18] : memref<32x4xf32, #tpu.memory_space<vmem>>, vector<32x4xf32>
    tpu.vector_store %arg6[%c0_17, %c0_18], %30 {strides = array<i32>} : memref<32x4xf32, #tpu.memory_space<vmem>>, vector<32x4xf32>,
    return
  }
}

</mosaic_0001>

<bundles_post_ra>
// kernel: tpu_custom_call.1
= control target key start
LH: loop header
LB: loop body
LE: loop exit
PB: predicated region body
PF: predicated region fallthrough
CT: control target
= control target key end

     0   :  { %vm42_vm0 = vcmask 1041408   ;;  %vm35_vm1 = vcmask 31744   ;;  %s271_s30 = smov 96   ;;  %vm93_vm2 = vcmask 261120   ;;  %s381_s2 = inlined_call_operand.vmem [shape: bf16[4,64], index: 2, kind: input, shape index: {}]   ;;  %s382_s0 = inlined_call_operand.vmem [shape: f32[32,4], index: 0, kind: input, shape index: {}]   ;;  %s383_s3 = inlined_call_operand.vmem [shape: f32[1,32], index: 3, kind: input, shape index: {}]   ;;  %s384_s1 = inlined_call_operand.vmem [shape: bf16[32,32], index: 1, kind: input, shape index: {}]   ;;  %s385_s4 = inlined_call_operand.vmem [shape: bf16[32,8], index: 4, kind: input, shape index: {}]   ;;  %s386_s5 = inlined_call_operand.vmem [shape: f32[1,4], index: 5, kind: input, shape index: {}]   ;;  %s387_s6 = inlined_call_operand.vmem [shape: f32[32,4], index: 6, kind: output, shape index: {}]  }
   0x1   :  { %v34_v0 = vld [vmem:[%s381_s2] sm:$0x3]  ;;  %v319_v2 = vld [vmem:[%s382_s0 + $0x8] sm:$0xff]  ;;  %v327_v5 = vld [vmem:[%s382_s0 + $0x10] sm:$0xff] }
   0x2   :  { %v314_v1 = vld [vmem:[%s382_s0] sm:$0xff]  ;;  %v44_v3 = vsel %vm42_vm0, %v34_v0, 0  ;;  %v332_v6 = vld [vmem:[%s382_s0 + $0x18] sm:$0xff]  ;;  %v264_v15 = vld [vmem:[%s384_s1 + $0x8] sm:$0xff] }
   0x3   :  { %v28_v4 = vpack.c.bf16 %v319_v2, %v314_v1  ;;  %53 = vmatpush.bf16.msra.mxu0 %v44_v3  ;;  %v29_v7 = vpack.c.bf16 %v332_v6, %v327_v5  ;;  %v263_v14 = vld [vmem:[%s384_s1] sm:$0xff]  ;;  %v266_v16 = vld [vmem:[%s385_s4 + $0x8] sm:$0xff]  ;;  %s272_s1 = smov 124  }
   0x4   :  { %161 = vmatpush.bf16.msra.mxu2 %v266_v16  ;;  %v265_v17 = vld [vmem:[%s385_s4] sm:$0xff] }
   0x5   :  { %v269_v21 = vld [vmem:[%s383_s3] ss:$0 sm:$0xff] }
   0x6   :  { %239 = vmatmul.msk.bf16.vlgmr.msra.gmra.mxu0 %vm35_vm1, %v28_v4  ;;  %v270_v48 = vld [vmem:[%s386_s5] ss:$0 sm:$0xff] }
   0x8   :  { %162 = vmatpush.bf16.msra.mxu2 %v265_v17 }
  0x16   :  { %240 = vmatmul.msk.bf16.gmra.mxu0 %vm35_vm1, %v29_v7 }
  0x83   :  { %v55_v8 = vpop.f32.mrf.mxu0 }
  0x84   :  { %81 = vrot.lane.b32.xlu0 %v55_v8, %s271_s30 }
  0x8b   :  { %v57_v9 = vpop.f32.mrf.mxu0 }
  0x8c   :  { %83 = vrot.lane.b32.xlu0 %v57_v9, %s271_s30  ;;  %v65_v13 = vpack.c.bf16 %v57_v9, %v55_v8 }
  0x93   :  { %v60_v10 = vpop.f32.mrf.mxu0 }
  0x94   :  { %85 = vrot.lane.b32.xlu1 %v60_v10, %s271_s30 }
  0x9b   :  { %v62_v11 = vpop.f32.mrf.mxu0 }
  0x9c   :  { %87 = vrot.lane.b32.xlu1 %v62_v11, %s271_s30  ;;  %v66_v12 = vpack.c.bf16 %v62_v11, %v60_v10 }
  0x9e   :  { %106 = vmatpush.bf16.msra.mxu1 %v66_v12 }
  0xa2   :  { %107 = vmatpush.bf16.msra.mxu1 %v65_v13 }
  0xa5   :  { %249 = vmatmul.msk.bf16.vlgmr.msra.gmra.mxu1 %vm93_vm2, %v263_v14 }
  0xb5   :  { %250 = vmatmul.msk.bf16.gmra.mxu1 %vm93_vm2, %v264_v15 }
  0xf6   :  { %v82_v18 = vpop.permute.xlu0 %81 }
  0xfe   :  { %v84_v22 = vpop.permute.xlu0 %83 }
 0x106   :  { %v86_v29 = vpop.permute.xlu1 %85 }
 0x10e   :  { %v88_v33 = vpop.permute.xlu1 %87 }
 0x122   :  { %v109_v19 = vpop.f32.mrf.mxu1 }
 0x123   :  { %v110_v20 = vadd.f32 %v109_v19, %v82_v18 }
 0x125   :  { %v123_v24 = vadd.f32 %v269_v21, %v110_v20 }
 0x127   :  { %v127_v27 = vmax.f32 %v123_v24, 0.0 }
 0x12a   :  { %v111_v23 = vpop.f32.mrf.mxu1 }
 0x12b   :  { %v112_v25 = vadd.f32 %v111_v23, %v84_v22 }
 0x12d   :  { %v124_v26 = vadd.f32 %v269_v21, %v112_v25 }
 0x12f   :  { %v128_v28 = vmax.f32 %v124_v26, 0.0 }
 0x131   :  { %v131_v30 = vpack.c.bf16 %v128_v28, %v127_v27 }
 0x132   :  { %v114_v31 = vpop.f32.mrf.mxu1 }
 0x133   :  { %259 = vmatmul.msk.bf16.vlgmr.msra.gmra.mxu2 %vm93_vm2, %v131_v30  ;;  %v115_v32 = vadd.f32 %v114_v31, %v86_v29 }
 0x135   :  { %v125_v35 = vadd.f32 %v269_v21, %v115_v32 }
 0x137   :  { %v129_v38 = vmax.f32 %v125_v35, 0.0 }
 0x13a   :  { %v116_v34 = vpop.f32.mrf.mxu1 }
 0x13b   :  { %v117_v36 = vadd.f32 %v116_v34, %v88_v33 }
 0x13d   :  { %v126_v37 = vadd.f32 %v269_v21, %v117_v36 }
 0x13f   :  { %v130_v39 = vmax.f32 %v126_v37, 0.0 }
 0x141   :  { %v132_v40 = vpack.c.bf16 %v130_v39, %v129_v38 }
 0x143   :  { %260 = vmatmul.msk.bf16.gmra.mxu2 %vm93_vm2, %v132_v40 }
 0x1b6   :  { %v164_v41 = vpop.f32.mrf.mxu2 }
 0x1b7   :  { %180 = vrot.lane.b32.xlu2 %v164_v41, %s272_s1 }
 0x1be   :  { %v166_v42 = vpop.f32.mrf.mxu2 }
 0x1bf   :  { %182 = vrot.lane.b32.xlu2 %v166_v42, %s272_s1  ;;  %v174_v46 = vpack.c.bf16 %v166_v42, %v164_v41 }
 0x1c6   :  { %v169_v43 = vpop.f32.mrf.mxu2 }
 0x1c7   :  { %184 = vrot.lane.b32.xlu0 %v169_v43, %s272_s1 }
 0x1ce   :  { %v171_v44 = vpop.f32.mrf.mxu2 }
 0x1cf   :  { %186 = vrot.lane.b32.xlu1 %v171_v44, %s272_s1  ;;  %v175_v45 = vpack.c.bf16 %v171_v44, %v169_v43 }
 0x1d1   :  { %198 = vmatpush.bf16.msra.mxu3 %v175_v45 }
 0x1d5   :  { %199 = vmatpush.bf16.msra.mxu3 %v174_v46 }
 0x1d8   :  { %261 = vmatmul.msk.bf16.vlgmr.msra.gmra.mxu3 %vm93_vm2, %v263_v14 }
 0x1e8   :  { %262 = vmatmul.msk.bf16.gmra.mxu3 %vm93_vm2, %v264_v15 }
 0x211   :  { %v181_v47 = vpop.permute.xlu2 %180 }
 0x219   :  { %v183_v54 = vpop.permute.xlu2 %182 }
 0x239   :  { %v185_v61 = vpop.permute.xlu0 %184 }
 0x241   :  { %v187_v7 = vpop.permute.xlu1 %186 }
 0x25b   :  { %v201_v49 = vpop.f32.mrf.mxu3 }
 0x25c   :  { %v202_v50 = vadd.f32 %v201_v49, %v181_v47 }
 0x25e   :  { %v215_v51 = vadd.f32 %v270_v48, %v202_v50 }
 0x260   :  { %v219_v52 = vmax.f32 %v215_v51, 0.0 }
 0x262   :  { %v223_v53 = vadd.f32 %v219_v52, %v314_v1 }
 0x263   :  { %v203_v55 = vpop.f32.mrf.mxu3 }
 0x264   :  { %v227_v56 = vmul.f32 0.5, %v223_v53  ;;  %v204_v57 = vadd.f32 %v203_v55, %v183_v54 }
 0x266   :  { %231 = vst.msk [vmem:[%s387_s6] sm:$0xff] %vm35_vm1, %v227_v56  ;;  %v216_v58 = vadd.f32 %v270_v48, %v204_v57 }
 0x268   :  { %v220_v59 = vmax.f32 %v216_v58, 0.0 }
 0x26a   :  { %v224_v60 = vadd.f32 %v220_v59, %v319_v2 }
 0x26b   :  { %v206_v62 = vpop.f32.mrf.mxu3 }
 0x26c   :  { %v228_v63 = vmul.f32 0.5, %v224_v60  ;;  %v207_v0 = vadd.f32 %v206_v62, %v185_v61 }
 0x26e   :  { %232 = vst.msk [vmem:[%s387_s6 + $0x8] sm:$0xff] %vm35_vm1, %v228_v63  ;;  %v217_v1 = vadd.f32 %v270_v48, %v207_v0 }
 0x270   :  { %v221_v3 = vmax.f32 %v217_v1, 0.0 }
 0x272   :  { %v225_v4 = vadd.f32 %v221_v3, %v327_v5 }
 0x273   :  { %v208_v8 = vpop.f32.mrf.mxu3 }
 0x274   :  { %v229_v9 = vmul.f32 0.5, %v225_v4  ;;  %v209_v10 = vadd.f32 %v208_v8, %v187_v7 }
 0x276   :  { %233 = vst.msk [vmem:[%s387_s6 + $0x10] sm:$0xff] %vm35_vm1, %v229_v9  ;;  %v218_v2 = vadd.f32 %v270_v48, %v209_v10 }
 0x278   :  { %v222_v11 = vmax.f32 %v218_v2, 0.0 }
 0x27a   :  { %v226_v12 = vadd.f32 %v222_v11, %v332_v6 }
 0x27c   :  { %v230_v13 = vmul.f32 0.5, %v226_v12 }
 0x27e   :  { %234 = vst.msk [vmem:[%s387_s6 + $0x18] sm:$0xff] %vm35_vm1, %v230_v13 }

</bundles_post_ra>
